<compile_context>
chip_gen: v7x
topology: tpu7x:2x2x1
jax: 0.10.0
libtpu: 0.0.40
codegen_flags: <defaults>
</compile_context>

<pallas_src>
import jax
import jax.numpy as jnp
from jax.experimental import pallas as pl
from jax.experimental.pallas import tpu as pltpu


def _conv1x1_prelu_kernel(w_ref, b_ref, a_ref, x_ref, o_ref):
    """Fused 1x1 conv + bias + PReLU on a lane-dense (Cin, TM) -> (Cout, TM) block.

    w_ref: (Cout, Cin) f32 in SMEM
    b_ref: (Cout,)     f32 in SMEM
    a_ref: (1,)        f32 in SMEM (shared PReLU slope)
    x_ref: (1, Cin, TM)  f32 in VMEM
    o_ref: (1, Cout, TM) f32 in VMEM
    """
    cin = x_ref.shape[1]
    cout = o_ref.shape[1]
    alpha = a_ref[0]
    x = x_ref[0]                                    # (Cin, TM), lane-dense

    rows = []
    for o in range(cout):                           # fully unrolled: Cout*Cin VPU FMAs
        acc = x[0:1, :] * w_ref[o, 0]
        for c in range(1, cin):
            acc = acc + x[c:c + 1, :] * w_ref[o, c]
        acc = acc + b_ref[o]
        rows.append(jnp.where(acc > 0.0, acc, alpha * acc))

    # single dense (Cout, TM) store -> full-width, unmasked lane stores
    o_ref[0] = jnp.concatenate(rows, axis=0).astype(o_ref.dtype)


def _pick_tile(hw_padded, max_elems=65536):
    """Largest 128-multiple tile that divides the (128-aligned) padded plane."""
    assert hw_padded % 128 == 0
    if hw_padded <= max_elems:
        return hw_padded
    k = hw_padded // 128
    for d in range(max_elems // 128, 0, -1):
        if k % d == 0:
            return 128 * d
    return 128


def conv1x1_prelu(xf, w, b, alpha, *, tm):
    """xf: (N, Cin, HWp) f32, HWp % tm == 0.  Returns PReLU(W @ x + b): (N, Cout, HWp)."""
    N, Cin, HWp = xf.shape
    Cout = w.shape[0]
    assert HWp % tm == 0

    grid = (N, HWp // tm)
    return pl.pallas_call(
        _conv1x1_prelu_kernel,
        out_shape=jax.ShapeDtypeStruct((N, Cout, HWp), jnp.float32),
        grid=grid,
        in_specs=[
            pl.BlockSpec(memory_space=pltpu.MemorySpace.SMEM),   # weight (Cout, Cin)
            pl.BlockSpec(memory_space=pltpu.MemorySpace.SMEM),   # bias   (Cout,)
            pl.BlockSpec(memory_space=pltpu.MemorySpace.SMEM),   # alpha  (1,)
            pl.BlockSpec((1, Cin, tm), lambda n, m: (n, 0, m)),  # x tile, spatial on lanes
        ],
        out_specs=pl.BlockSpec((1, Cout, tm), lambda n, m: (n, 0, m)),
        compiler_params=pltpu.CompilerParams(
            dimension_semantics=("parallel", "parallel"),
            vmem_limit_bytes=32 * 1024 * 1024,  # safe on v5e/v6e/v7x; tiles stay far below
        ),
    )(w, b, alpha, xf)


def pixel_shuffle_nchw(x, r=2):
    # x: (N, C*r*r, H, W) -> (N, C, H*r, W*r), matching torch.nn.PixelShuffle
    N, Crr, H, W = x.shape
    C = Crr // (r * r)
    x = x.reshape(N, C, r, r, H, W)
    x = jnp.transpose(x, (0, 1, 4, 2, 5, 3))  # N, C, H, r, W, r
    return x.reshape(N, C, H * r, W * r)


def upsample_block_v1(x, weight, bias, alpha):
    """x: (N, Cin, H, W) float32 (NCHW).
    weight: (Cout, Cin) (1x1 conv), bias: (Cout,), alpha: scalar PReLU slope.
    Returns PReLU(PixelShuffle2(Conv1x1(x))): (N, Cout//4, 2H, 2W)."""
    N, Cin, H, W = x.shape
    Cout = weight.shape[0]
    HW = H * W

    xf = x.reshape(N, Cin, HW)                        # free view for NCHW data
    HWp = ((HW + 127) // 128) * 128                   # pad lanes to a dense multiple of 128
    if HWp != HW:
        xf = jnp.pad(xf, ((0, 0), (0, 0), (0, HWp - HW)))

    w = weight.astype(jnp.float32)
    b = bias.astype(jnp.float32)
    a = jnp.asarray(alpha, jnp.float32).reshape(1,)

    tm = _pick_tile(HWp)
    yf = conv1x1_prelu(xf, w, b, a, tm=tm)            # (N, Cout, HWp), PReLU fused
    if HWp != HW:
        yf = yf[:, :, :HW]
    y = yf.reshape(N, Cout, H, W)                     # already NCHW, free

    # NOTE: PReLU with a single shared alpha commutes with PixelShuffle, so fusing it
    # into the conv kernel is exact.  Per-channel alpha would require shuffling first.
    # TODO(synk): fuse the pixel-shuffle interleave into the kernel's output stores to
    # drop this last (small) reshape+transpose HBM pass.
    return pixel_shuffle_nchw(y, r=2)


if __name__ == "__main__":
    key = jax.random.PRNGKey(0)
    k_x, k_w, k_b = jax.random.split(key, 3)

    N, Cin, H, W = 2, 4, 16, 16
    Cout = 8  # must be divisible by 4 for PixelShuffle(2)

    x = jax.random.normal(k_x, (N, Cin, H, W), dtype=jnp.float32)
    weight = 0.1 * jax.random.normal(k_w, (Cout, Cin), dtype=jnp.float32)
    bias = 0.05 * jax.random.normal(k_b, (Cout,), dtype=jnp.float32)
    alpha = jnp.float32(0.25)  # nn.PReLU() default init

    out = upsample_block_v1(x, weight, bias, alpha)
    out = jax.block_until_ready(out)

    # reference in plain JAX (conv -> shuffle -> prelu, like the PyTorch module)
    y_ref = jnp.einsum("nchw,oc->nohw", x, weight) + bias[None, :, None, None]
    y_ref = pixel_shuffle_nchw(y_ref, r=2)
    y_ref = jnp.where(y_ref > 0, y_ref, alpha * y_ref)

    assert out.shape == (N, Cout // 4, 2 * H, 2 * W)
    assert jnp.allclose(out, y_ref, atol=1e-5, rtol=1e-5)

    print("KERNEL_OK")
</pallas_src>

<mosaic_0001>
module attributes {stable_mosaic.version = 11 : i64} {
  func.func @_conv1x1_prelu_kernel(%arg0: i32, %arg1: i32, %arg2: memref<8x4xf32, #tpu.memory_space<smem>>, %arg3: memref<8xf32, #tpu.memory_space<smem>>, %arg4: memref<1xf32, #tpu.memory_space<smem>>, %arg5: memref<1x4x256xf32, #tpu.memory_space<vmem>>, %arg6: memref<1x8x256xf32, #tpu.memory_space<vmem>>) attributes {dimension_semantics = [#tpu.dimension_semantics<parallel>, #tpu.dimension_semantics<parallel>], iteration_bounds = array<i64: 2, 1>, scalar_prefetch = 0 : i64, scratch_operands = 0 : i64, tpu.core_type = #tpu.core_type<tc>, window_params = [{transform_indices = @transform_0, window_bounds = array<i64: 8, 4>}, {transform_indices = @transform_1, window_bounds = array<i64: 8>}, {transform_indices = @transform_2, window_bounds = array<i64: 1>}, {transform_indices = @transform_3, window_bounds = array<i64: 1, 4, 256>}, {transform_indices = @transform_4, window_bounds = array<i64: 1, 8, 256>}]} {
    %c0 = arith.constant 0 : index
    %0 = memref.load %arg4[%c0] : memref<1xf32, #tpu.memory_space<smem>>
    %c0_0 = arith.constant 0 : index
    %c0_1 = arith.constant 0 : index
    %c0_2 = arith.constant 0 : index
    %1 = vector.load %arg5[%c0_0, %c0_1, %c0_2] : memref<1x4x256xf32, #tpu.memory_space<vmem>>, vector<1x4x256xf32>
    %2 = vector.shape_cast %1 : vector<1x4x256xf32> to vector<4x256xf32>
    %3 = vector.extract_strided_slice %2 {offsets = [0, 0], sizes = [1, 256], strides = [1, 1]} : vector<4x256xf32> to vector<1x256xf32>
    %c0_3 = arith.constant 0 : index
    %c0_4 = arith.constant 0 : index
    %4 = memref.load %arg2[%c0_3, %c0_4] : memref<8x4xf32, #tpu.memory_space<smem>>
    %5 = vector.broadcast %4 : f32 to vector<1x256xf32>
    %6 = arith.mulf %3, %5 : vector<1x256xf32>
    %7 = vector.extract_strided_slice %2 {offsets = [1, 0], sizes = [1, 256], strides = [1, 1]} : vector<4x256xf32> to vector<1x256xf32>
    %c0_5 = arith.constant 0 : index
    %c1 = arith.constant 1 : index
    %8 = memref.load %arg2[%c0_5, %c1] : memref<8x4xf32, #tpu.memory_space<smem>>
    %9 = vector.broadcast %8 : f32 to vector<1x256xf32>
    %10 = arith.mulf %7, %9 : vector<1x256xf32>
    %11 = arith.addf %6, %10 : vector<1x256xf32>
    %12 = vector.extract_strided_slice %2 {offsets = [2, 0], sizes = [1, 256], strides = [1, 1]} : vector<4x256xf32> to vector<1x256xf32>
    %c0_6 = arith.constant 0 : index
    %c2 = arith.constant 2 : index
    %13 = memref.load %arg2[%c0_6, %c2] : memref<8x4xf32, #tpu.memory_space<smem>>
    %14 = vector.broadcast %13 : f32 to vector<1x256xf32>
    %15 = arith.mulf %12, %14 : vector<1x256xf32>
    %16 = arith.addf %11, %15 : vector<1x256xf32>
    %17 = vector.extract_strided_slice %2 {offsets = [3, 0], sizes = [1, 256], strides = [1, 1]} : vector<4x256xf32> to vector<1x256xf32>
    %c0_7 = arith.constant 0 : index
    %c3 = arith.constant 3 : index
    %18 = memref.load %arg2[%c0_7, %c3] : memref<8x4xf32, #tpu.memory_space<smem>>
    %19 = vector.broadcast %18 : f32 to vector<1x256xf32>
    %20 = arith.mulf %17, %19 : vector<1x256xf32>
    %21 = arith.addf %16, %20 : vector<1x256xf32>
    %c0_8 = arith.constant 0 : index
    %22 = memref.load %arg3[%c0_8] : memref<8xf32, #tpu.memory_space<smem>>
    %23 = vector.broadcast %22 : f32 to vector<1x256xf32>
    %24 = arith.addf %21, %23 : vector<1x256xf32>
    %cst = arith.constant 0.000000e+00 : f32
    %25 = vector.broadcast %cst : f32 to vector<1x256xf32>
    %26 = arith.cmpf ogt, %24, %25 : vector<1x256xf32>
    %27 = vector.broadcast %0 : f32 to vector<1x256xf32>
    %28 = arith.mulf %27, %24 : vector<1x256xf32>
    %29 = arith.select %26, %24, %28 : vector<1x256xi1>, vector<1x256xf32>
    %30 = vector.extract_strided_slice %2 {offsets = [0, 0], sizes = [1, 256], strides = [1, 1]} : vector<4x256xf32> to vector<1x256xf32>
    %c1_9 = arith.constant 1 : index
    %c0_10 = arith.constant 0 : index
    %31 = memref.load %arg2[%c1_9, %c0_10] : memref<8x4xf32, #tpu.memory_space<smem>>
    %32 = vector.broadcast %31 : f32 to vector<1x256xf32>
    %33 = arith.mulf %30, %32 : vector<1x256xf32>
    %34 = vector.extract_strided_slice %2 {offsets = [1, 0], sizes = [1, 256], strides = [1, 1]} : vector<4x256xf32> to vector<1x256xf32>
    %c1_11 = arith.constant 1 : index
    %c1_12 = arith.constant 1 : index
    %35 = memref.load %arg2[%c1_11, %c1_12] : memref<8x4xf32, #tpu.memory_space<smem>>
    %36 = vector.broadcast %35 : f32 to vector<1x256xf32>
    %37 = arith.mulf %34, %36 : vector<1x256xf32>
    %38 = arith.addf %33, %37 : vector<1x256xf32>
    %39 = vector.extract_strided_slice %2 {offsets = [2, 0], sizes = [1, 256], strides = [1, 1]} : vector<4x256xf32> to vector<1x256xf32>
    %c1_13 = arith.constant 1 : index
    %c2_14 = arith.constant 2 : index
    %40 = memref.load %arg2[%c1_13, %c2_14] : memref<8x4xf32, #tpu.memory_space<smem>>
    %41 = vector.broadcast %40 : f32 to vector<1x256xf32>
    %42 = arith.mulf %39, %41 : vector<1x256xf32>
    %43 = arith.addf %38, %42 : vector<1x256xf32>
    %44 = vector.extract_strided_slice %2 {offsets = [3, 0], sizes = [1, 256], strides = [1, 1]} : vector<4x256xf32> to vector<1x256xf32>
    %c1_15 = arith.constant 1 : index
    %c3_16 = arith.constant 3 : index
    %45 = memref.load %arg2[%c1_15, %c3_16] : memref<8x4xf32, #tpu.memory_space<smem>>
    %46 = vector.broadcast %45 : f32 to vector<1x256xf32>
    %47 = arith.mulf %44, %46 : vector<1x256xf32>
    %48 = arith.addf %43, %47 : vector<1x256xf32>
    %c1_17 = arith.constant 1 : index
    %49 = memref.load %arg3[%c1_17] : memref<8xf32, #tpu.memory_space<smem>>
    %50 = vector.broadcast %49 : f32 to vector<1x256xf32>
    %51 = arith.addf %48, %50 : vector<1x256xf32>
    %cst_18 = arith.constant 0.000000e+00 : f32
    %52 = vector.broadcast %cst_18 : f32 to vector<1x256xf32>
    %53 = arith.cmpf ogt, %51, %52 : vector<1x256xf32>
    %54 = vector.broadcast %0 : f32 to vector<1x256xf32>
    %55 = arith.mulf %54, %51 : vector<1x256xf32>
    %56 = arith.select %53, %51, %55 : vector<1x256xi1>, vector<1x256xf32>
    %57 = vector.extract_strided_slice %2 {offsets = [0, 0], sizes = [1, 256], strides = [1, 1]} : vector<4x256xf32> to vector<1x256xf32>
    %c2_19 = arith.constant 2 : index
    %c0_20 = arith.constant 0 : index
    %58 = memref.load %arg2[%c2_19, %c0_20] : memref<8x4xf32, #tpu.memory_space<smem>>
    %59 = vector.broadcast %58 : f32 to vector<1x256xf32>
    %60 = arith.mulf %57, %59 : vector<1x256xf32>
    %61 = vector.extract_strided_slice %2 {offsets = [1, 0], sizes = [1, 256], strides = [1, 1]} : vector<4x256xf32> to vector<1x256xf32>
    %c2_21 = arith.constant 2 : index
    %c1_22 = arith.constant 1 : index
    %62 = memref.load %arg2[%c2_21, %c1_22] : memref<8x4xf32, #tpu.memory_space<smem>>
    %63 = vector.broadcast %62 : f32 to vector<1x256xf32>
    %64 = arith.mulf %61, %63 : vector<1x256xf32>
    %65 = arith.addf %60, %64 : vector<1x256xf32>
    %66 = vector.extract_strided_slice %2 {offsets = [2, 0], sizes = [1, 256], strides = [1, 1]} : vector<4x256xf32> to vector<1x256xf32>
    %c2_23 = arith.constant 2 : index
    %c2_24 = arith.constant 2 : index
    %67 = memref.load %arg2[%c2_23, %c2_24] : memref<8x4xf32, #tpu.memory_space<smem>>
    %68 = vector.broadcast %67 : f32 to vector<1x256xf32>
    %69 = arith.mulf %66, %68 : vector<1x256xf32>
    %70 = arith.addf %65, %69 : vector<1x256xf32>
    %71 = vector.extract_strided_slice %2 {offsets = [3, 0], sizes = [1, 256], strides = [1, 1]} : vector<4x256xf32> to vector<1x256xf32>
    %c2_25 = arith.constant 2 : index
    %c3_26 = arith.constant 3 : index
    %72 = memref.load %arg2[%c2_25, %c3_26] : memref<8x4xf32, #tpu.memory_space<smem>>
    %73 = vector.broadcast %72 : f32 to vector<1x256xf32>
    %74 = arith.mulf %71, %73 : vector<1x256xf32>
    %75 = arith.addf %70, %74 : vector<1x256xf32>
    %c2_27 = arith.constant 2 : index
    %76 = memref.load %arg3[%c2_27] : memref<8xf32, #tpu.memory_space<smem>>
    %77 = vector.broadcast %76 : f32 to vector<1x256xf32>
    %78 = arith.addf %75, %77 : vector<1x256xf32>
    %cst_28 = arith.constant 0.000000e+00 : f32
    %79 = vector.broadcast %cst_28 : f32 to vector<1x256xf32>
    %80 = arith.cmpf ogt, %78, %79 : vector<1x256xf32>
    %81 = vector.broadcast %0 : f32 to vector<1x256xf32>
    %82 = arith.mulf %81, %78 : vector<1x256xf32>
    %83 = arith.select %80, %78, %82 : vector<1x256xi1>, vector<1x256xf32>
    %84 = vector.extract_strided_slice %2 {offsets = [0, 0], sizes = [1, 256], strides = [1, 1]} : vector<4x256xf32> to vector<1x256xf32>
    %c3_29 = arith.constant 3 : index
    %c0_30 = arith.constant 0 : index
    %85 = memref.load %arg2[%c3_29, %c0_30] : memref<8x4xf32, #tpu.memory_space<smem>>
    %86 = vector.broadcast %85 : f32 to vector<1x256xf32>
    %87 = arith.mulf %84, %86 : vector<1x256xf32>
    %88 = vector.extract_strided_slice %2 {offsets = [1, 0], sizes = [1, 256], strides = [1, 1]} : vector<4x256xf32> to vector<1x256xf32>
    %c3_31 = arith.constant 3 : index
    %c1_32 = arith.constant 1 : index
    %89 = memref.load %arg2[%c3_31, %c1_32] : memref<8x4xf32, #tpu.memory_space<smem>>
    %90 = vector.broadcast %89 : f32 to vector<1x256xf32>
    %91 = arith.mulf %88, %90 : vector<1x256xf32>
    %92 = arith.addf %87, %91 : vector<1x256xf32>
    %93 = vector.extract_strided_slice %2 {offsets = [2, 0], sizes = [1, 256], strides = [1, 1]} : vector<4x256xf32> to vector<1x256xf32>
    %c3_33 = arith.constant 3 : index
    %c2_34 = arith.constant 2 : index
    %94 = memref.load %arg2[%c3_33, %c2_34] : memref<8x4xf32, #tpu.memory_space<smem>>
    %95 = vector.broadcast %94 : f32 to vector<1x256xf32>
    %96 = arith.mulf %93, %95 : vector<1x256xf32>
    %97 = arith.addf %92, %96 : vector<1x256xf32>
    %98 = vector.extract_strided_slice %2 {offsets = [3, 0], sizes = [1, 256], strides = [1, 1]} : vector<4x256xf32> to vector<1x256xf32>
    %c3_35 = arith.constant 3 : index
    %c3_36 = arith.constant 3 : index
    %99 = memref.load %arg2[%c3_35, %c3_36] : memref<8x4xf32, #tpu.memory_space<smem>>
    %100 = vector.broadcast %99 : f32 to vector<1x256xf32>
    %101 = arith.mulf %98, %100 : vector<1x256xf32>
    %102 = arith.addf %97, %101 : vector<1x256xf32>
    %c3_37 = arith.constant 3 : index
    %103 = memref.load %arg3[%c3_37] : memref<8xf32, #tpu.memory_space<smem>>
    %104 = vector.broadcast %103 : f32 to vector<1x256xf32>
    %105 = arith.addf %102, %104 : vector<1x256xf32>
    %cst_38 = arith.constant 0.000000e+00 : f32
    %106 = vector.broadcast %cst_38 : f32 to vector<1x256xf32>
    %107 = arith.cmpf ogt, %105, %106 : vector<1x256xf32>
    %108 = vector.broadcast %0 : f32 to vector<1x256xf32>
    %109 = arith.mulf %108, %105 : vector<1x256xf32>
    %110 = arith.select %107, %105, %109 : vector<1x256xi1>, vector<1x256xf32>
    %111 = vector.extract_strided_slice %2 {offsets = [0, 0], sizes = [1, 256], strides = [1, 1]} : vector<4x256xf32> to vector<1x256xf32>
    %c4 = arith.constant 4 : index
    %c0_39 = arith.constant 0 : index
    %112 = memref.load %arg2[%c4, %c0_39] : memref<8x4xf32, #tpu.memory_space<smem>>
    %113 = vector.broadcast %112 : f32 to vector<1x256xf32>
    %114 = arith.mulf %111, %113 : vector<1x256xf32>
    %115 = vector.extract_strided_slice %2 {offsets = [1, 0], sizes = [1, 256], strides = [1, 1]} : vector<4x256xf32> to vector<1x256xf32>
    %c4_40 = arith.constant 4 : index
    %c1_41 = arith.constant 1 : index
    %116 = memref.load %arg2[%c4_40, %c1_41] : memref<8x4xf32, #tpu.memory_space<smem>>
    %117 = vector.broadcast %116 : f32 to vector<1x256xf32>
    %118 = arith.mulf %115, %117 : vector<1x256xf32>
    %119 = arith.addf %114, %118 : vector<1x256xf32>
    %120 = vector.extract_strided_slice %2 {offsets = [2, 0], sizes = [1, 256], strides = [1, 1]} : vector<4x256xf32> to vector<1x256xf32>
    %c4_42 = arith.constant 4 : index
    %c2_43 = arith.constant 2 : index
    %121 = memref.load %arg2[%c4_42, %c2_43] : memref<8x4xf32, #tpu.memory_space<smem>>
    %122 = vector.broadcast %121 : f32 to vector<1x256xf32>
    %123 = arith.mulf %120, %122 : vector<1x256xf32>
    %124 = arith.addf %119, %123 : vector<1x256xf32>
    %125 = vector.extract_strided_slice %2 {offsets = [3, 0], sizes = [1, 256], strides = [1, 1]} : vector<4x256xf32> to vector<1x256xf32>
    %c4_44 = arith.constant 4 : index
    %c3_45 = arith.constant 3 : index
    %126 = memref.load %arg2[%c4_44, %c3_45] : memref<8x4xf32, #tpu.memory_space<smem>>
    %127 = vector.broadcast %126 : f32 to vector<1x256xf32>
    %128 = arith.mulf %125, %127 : vector<1x256xf32>
    %129 = arith.addf %124, %128 : vector<1x256xf32>
    %c4_46 = arith.constant 4 : index
    %130 = memref.load %arg3[%c4_46] : memref<8xf32, #tpu.memory_space<smem>>
    %131 = vector.broadcast %130 : f32 to vector<1x256xf32>
    %132 = arith.addf %129, %131 : vector<1x256xf32>
    %cst_47 = arith.constant 0.000000e+00 : f32
    %133 = vector.broadcast %cst_47 : f32 to vector<1x256xf32>
    %134 = arith.cmpf ogt, %132, %133 : vector<1x256xf32>
    %135 = vector.broadcast %0 : f32 to vector<1x256xf32>
    %136 = arith.mulf %135, %132 : vector<1x256xf32>
    %137 = arith.select %134, %132, %136 : vector<1x256xi1>, vector<1x256xf32>
    %138 = vector.extract_strided_slice %2 {offsets = [0, 0], sizes = [1, 256], strides = [1, 1]} : vector<4x256xf32> to vector<1x256xf32>
    %c5 = arith.constant 5 : index
    %c0_48 = arith.constant 0 : index
    %139 = memref.load %arg2[%c5, %c0_48] : memref<8x4xf32, #tpu.memory_space<smem>>
    %140 = vector.broadcast %139 : f32 to vector<1x256xf32>
    %141 = arith.mulf %138, %140 : vector<1x256xf32>
    %142 = vector.extract_strided_slice %2 {offsets = [1, 0], sizes = [1, 256], strides = [1, 1]} : vector<4x256xf32> to vector<1x256xf32>
    %c5_49 = arith.constant 5 : index
    %c1_50 = arith.constant 1 : index
    %143 = memref.load %arg2[%c5_49, %c1_50] : memref<8x4xf32, #tpu.memory_space<smem>>
    %144 = vector.broadcast %143 : f32 to vector<1x256xf32>
    %145 = arith.mulf %142, %144 : vector<1x256xf32>
    %146 = arith.addf %141, %145 : vector<1x256xf32>
    %147 = vector.extract_strided_slice %2 {offsets = [2, 0], sizes = [1, 256], strides = [1, 1]} : vector<4x256xf32> to vector<1x256xf32>
    %c5_51 = arith.constant 5 : index
    %c2_52 = arith.constant 2 : index
    %148 = memref.load %arg2[%c5_51, %c2_52] : memref<8x4xf32, #tpu.memory_space<smem>>
    %149 = vector.broadcast %148 : f32 to vector<1x256xf32>
    %150 = arith.mulf %147, %149 : vector<1x256xf32>
    %151 = arith.addf %146, %150 : vector<1x256xf32>
    %152 = vector.extract_strided_slice %2 {offsets = [3, 0], sizes = [1, 256], strides = [1, 1]} : vector<4x256xf32> to vector<1x256xf32>
    %c5_53 = arith.constant 5 : index
    %c3_54 = arith.constant 3 : index
    %153 = memref.load %arg2[%c5_53, %c3_54] : memref<8x4xf32, #tpu.memory_space<smem>>
    %154 = vector.broadcast %153 : f32 to vector<1x256xf32>
    %155 = arith.mulf %152, %154 : vector<1x256xf32>
    %156 = arith.addf %151, %155 : vector<1x256xf32>
    %c5_55 = arith.constant 5 : index
    %157 = memref.load %arg3[%c5_55] : memref<8xf32, #tpu.memory_space<smem>>
    %158 = vector.broadcast %157 : f32 to vector<1x256xf32>
    %159 = arith.addf %156, %158 : vector<1x256xf32>
    %cst_56 = arith.constant 0.000000e+00 : f32
    %160 = vector.broadcast %cst_56 : f32 to vector<1x256xf32>
    %161 = arith.cmpf ogt, %159, %160 : vector<1x256xf32>
    %162 = vector.broadcast %0 : f32 to vector<1x256xf32>
    %163 = arith.mulf %162, %159 : vector<1x256xf32>
    %164 = arith.select %161, %159, %163 : vector<1x256xi1>, vector<1x256xf32>
    %165 = vector.extract_strided_slice %2 {offsets = [0, 0], sizes = [1, 256], strides = [1, 1]} : vector<4x256xf32> to vector<1x256xf32>
    %c6 = arith.constant 6 : index
    %c0_57 = arith.constant 0 : index
    %166 = memref.load %arg2[%c6, %c0_57] : memref<8x4xf32, #tpu.memory_space<smem>>
    %167 = vector.broadcast %166 : f32 to vector<1x256xf32>
    %168 = arith.mulf %165, %167 : vector<1x256xf32>
    %169 = vector.extract_strided_slice %2 {offsets = [1, 0], sizes = [1, 256], strides = [1, 1]} : vector<4x256xf32> to vector<1x256xf32>
    %c6_58 = arith.constant 6 : index
    %c1_59 = arith.constant 1 : index
    %170 = memref.load %arg2[%c6_58, %c1_59] : memref<8x4xf32, #tpu.memory_space<smem>>
    %171 = vector.broadcast %170 : f32 to vector<1x256xf32>
    %172 = arith.mulf %169, %171 : vector<1x256xf32>
    %173 = arith.addf %168, %172 : vector<1x256xf32>
    %174 = vector.extract_strided_slice %2 {offsets = [2, 0], sizes = [1, 256], strides = [1, 1]} : vector<4x256xf32> to vector<1x256xf32>
    %c6_60 = arith.constant 6 : index
    %c2_61 = arith.constant 2 : index
    %175 = memref.load %arg2[%c6_60, %c2_61] : memref<8x4xf32, #tpu.memory_space<smem>>
    %176 = vector.broadcast %175 : f32 to vector<1x256xf32>
    %177 = arith.mulf %174, %176 : vector<1x256xf32>
    %178 = arith.addf %173, %177 : vector<1x256xf32>
    %179 = vector.extract_strided_slice %2 {offsets = [3, 0], sizes = [1, 256], strides = [1, 1]} : vector<4x256xf32> to vector<1x256xf32>
    %c6_62 = arith.constant 6 : index
    %c3_63 = arith.constant 3 : index
    %180 = memref.load %arg2[%c6_62, %c3_63] : memref<8x4xf32, #tpu.memory_space<smem>>
    %181 = vector.broadcast %180 : f32 to vector<1x256xf32>
    %182 = arith.mulf %179, %181 : vector<1x256xf32>
    %183 = arith.addf %178, %182 : vector<1x256xf32>
    %c6_64 = arith.constant 6 : index
    %184 = memref.load %arg3[%c6_64] : memref<8xf32, #tpu.memory_space<smem>>
    %185 = vector.broadcast %184 : f32 to vector<1x256xf32>
    %186 = arith.addf %183, %185 : vector<1x256xf32>
    %cst_65 = arith.constant 0.000000e+00 : f32
    %187 = vector.broadcast %cst_65 : f32 to vector<1x256xf32>
    %188 = arith.cmpf ogt, %186, %187 : vector<1x256xf32>
    %189 = vector.broadcast %0 : f32 to vector<1x256xf32>
    %190 = arith.mulf %189, %186 : vector<1x256xf32>
    %191 = arith.select %188, %186, %190 : vector<1x256xi1>, vector<1x256xf32>
    %192 = vector.extract_strided_slice %2 {offsets = [0, 0], sizes = [1, 256], strides = [1, 1]} : vector<4x256xf32> to vector<1x256xf32>
    %c7 = arith.constant 7 : index
    %c0_66 = arith.constant 0 : index
    %193 = memref.load %arg2[%c7, %c0_66] : memref<8x4xf32, #tpu.memory_space<smem>>
    %194 = vector.broadcast %193 : f32 to vector<1x256xf32>
    %195 = arith.mulf %192, %194 : vector<1x256xf32>
    %196 = vector.extract_strided_slice %2 {offsets = [1, 0], sizes = [1, 256], strides = [1, 1]} : vector<4x256xf32> to vector<1x256xf32>
    %c7_67 = arith.constant 7 : index
    %c1_68 = arith.constant 1 : index
    %197 = memref.load %arg2[%c7_67, %c1_68] : memref<8x4xf32, #tpu.memory_space<smem>>
    %198 = vector.broadcast %197 : f32 to vector<1x256xf32>
    %199 = arith.mulf %196, %198 : vector<1x256xf32>
    %200 = arith.addf %195, %199 : vector<1x256xf32>
    %201 = vector.extract_strided_slice %2 {offsets = [2, 0], sizes = [1, 256], strides = [1, 1]} : vector<4x256xf32> to vector<1x256xf32>
    %c7_69 = arith.constant 7 : index
    %c2_70 = arith.constant 2 : index
    %202 = memref.load %arg2[%c7_69, %c2_70] : memref<8x4xf32, #tpu.memory_space<smem>>
    %203 = vector.broadcast %202 : f32 to vector<1x256xf32>
    %204 = arith.mulf %201, %203 : vector<1x256xf32>
    %205 = arith.addf %200, %204 : vector<1x256xf32>
    %206 = vector.extract_strided_slice %2 {offsets = [3, 0], sizes = [1, 256], strides = [1, 1]} : vector<4x256xf32> to vector<1x256xf32>
    %c7_71 = arith.constant 7 : index
    %c3_72 = arith.constant 3 : index
    %207 = memref.load %arg2[%c7_71, %c3_72] : memref<8x4xf32, #tpu.memory_space<smem>>
    %208 = vector.broadcast %207 : f32 to vector<1x256xf32>
    %209 = arith.mulf %206, %208 : vector<1x256xf32>
    %210 = arith.addf %205, %209 : vector<1x256xf32>
    %c7_73 = arith.constant 7 : index
    %211 = memref.load %arg3[%c7_73] : memref<8xf32, #tpu.memory_space<smem>>
    %212 = vector.broadcast %211 : f32 to vector<1x256xf32>
    %213 = arith.addf %210, %212 : vector<1x256xf32>
    %cst_74 = arith.constant 0.000000e+00 : f32
    %214 = vector.broadcast %cst_74 : f32 to vector<1x256xf32>
    %215 = arith.cmpf ogt, %213, %214 : vector<1x256xf32>
    %216 = vector.broadcast %0 : f32 to vector<1x256xf32>
    %217 = arith.mulf %216, %213 : vector<1x256xf32>
    %218 = arith.select %215, %213, %217 : vector<1x256xi1>, vector<1x256xf32>
    %219 = tpu.concatenate %29, %56, %83, %110, %137, %164, %191, %218 in 0 : vector<1x256xf32>, vector<1x256xf32>, vector<1x256xf32>, vector<1x256xf32>, vector<1x256xf32>, vector<1x256xf32>, vector<1x256xf32>, vector<1x256xf32> -> vector<8x256xf32>
    %c0_75 = arith.constant 0 : index
    %c0_76 = arith.constant 0 : index
    %c0_77 = arith.constant 0 : index
    %220 = vector.load %arg6[%c0_75, %c0_76, %c0_77] : memref<1x8x256xf32, #tpu.memory_space<vmem>>, vector<1x8x256xf32>
    %221 = vector.shape_cast %220 : vector<1x8x256xf32> to vector<8x256xf32>
    %222 = vector.shape_cast %219 : vector<8x256xf32> to vector<1x8x256xf32>
    tpu.vector_store %arg6[%c0_75, %c0_76, %c0_77], %222 {strides = array<i32>} : memref<1x8x256xf32, #tpu.memory_space<vmem>>, vector<1x8x256xf32>,
    return
  }
  func.func @transform_0(%arg0: i32, %arg1: i32) -> (i32, i32) {
    %c0_i32 = arith.constant 0 : i32
    %c0_i32_0 = arith.constant 0 : i32
    %c0_i32_1 = arith.constant 0 : i32
    return %c0_i32, %c0_i32_0 : i32, i32
  }
  func.func @transform_1(%arg0: i32, %arg1: i32) -> i32 {
    %c0_i32 = arith.constant 0 : i32
    %c0_i32_0 = arith.constant 0 : i32
    return %c0_i32 : i32
  }
  func.func @transform_2(%arg0: i32, %arg1: i32) -> i32 {
    %c0_i32 = arith.constant 0 : i32
    %c0_i32_0 = arith.constant 0 : i32
    return %c0_i32 : i32
  }
  func.func @transform_3(%arg0: i32, %arg1: i32) -> (i32, i32, i32) {
    %c0_i32 = arith.constant 0 : i32
    %c0_i32_0 = arith.constant 0 : i32
    return %arg0, %c0_i32, %arg1 : i32, i32, i32
  }
  func.func @transform_4(%arg0: i32, %arg1: i32) -> (i32, i32, i32) {
    %c0_i32 = arith.constant 0 : i32
    %c0_i32_0 = arith.constant 0 : i32
    return %arg0, %c0_i32, %arg1 : i32, i32, i32
  }
}

</mosaic_0001>

<bundles_post_ra>
// kernel: tpu_custom_call.1
= control target key start
LH: loop header
LB: loop body
LE: loop exit
PB: predicated region body
PF: predicated region fallthrough
CT: control target
= control target key end

     0   :  { %s1404_s0 = inlined_call_operand.vmem [shape: f32[8,4], index: 0, kind: input, shape index: {}]   ;;  %s1405_s1 = inlined_call_operand.vmem [shape: f32[8], index: 1, kind: input, shape index: {}]   ;;  %s1406_s2 = inlined_call_operand.<no memory space> [shape: f32[1], index: 2, kind: input, shape index: {}]   ;;  %s1407_s3 = inlined_call_operand.vmem [shape: f32[2,4,256], index: 3, kind: input, shape index: {}]   ;;  %s1408_s4 = inlined_call_operand.hbm [shape: f32[2,8,256], index: 4, kind: output, shape index: {}]  }
   0x1   :  { %9 = sst [smem:[#allocation2]] %s1406_s2 }
   0x2   :  { %10 = vsyncpa [#allocation5], 0 }
   0x3   :  { %11 = vsyncpa [#allocation7], 0 }
   0x4   :  { %12 = vsyncpa [#allocation4], 0 }
   0x5   :  { %14 = vsyncpa [#allocation4 + $0x1], 0  ;;  %s1054_s17 = smov 0   ;;  %s1056_s18 = smov 0  }
   0x6   :  { %s1058_s19 = smov 0   ;;  %s1060_s20 = smov 0  }
   0x7   :  { %s1062_s21 = smov 0   ;;  %s1064_s22 = smov 0  }
   0x8 LB: > { %s748_s2 = sadd.s32 4294967295, %s1021_s22   ;;  %s749_s23 = sadd.s32 4294967294, %s1021_s22   ;;  %s1021_s22 = sphi %s1064_s22, %s20_s22   ;;  %s1017_s21 = sphi %s1062_s21, %s1426_s21   ;;  %s1013_s20 = sphi %s1060_s20, %s1425_s20   ;;  %s1009_s19 = sphi %s1058_s19, %s1424_s19   ;;  %s1005_s18 = sphi %s1056_s18, %s1423_s18   ;;  %s1001_s17 = sphi %s1054_s17, %s1422_s17  }
   0x9   : > { %s32_s24 = sadd.s32 1, %s1017_s21  ;;  %s132_s25 = sadd.s32 1, %s1009_s19 }
   0xa   : > { %p34_p0 = scmp.ge.s32.totalorder %s32_s24, 2  ;;  %p142_p1 = scmp.ne.s32.totalorder %s1009_s19, %s1005_s18 }
   0xb   : > { %p143_p2 = scmp.eq.s32.totalorder %s748_s2, 1  ;;  %p148_p3 = scmp.ne.s32.totalorder %s1005_s18, %s1001_s17 }
   0xc   : > { %s1428_s24 = smov (%p34_p0, %s32_s24), 0  ;;  %p149_p5 = scmp.eq.s32.totalorder %s749_s23, 1 }
   0xd   : > { %p1094_p4 = por %p143_p2, %p142_p1  ;;  %s127_s27 = ssub.s32 %s1017_s21, %s1428_s24 }
   0xe   : > { %p750_p6 = scmp.ge.s32.totalorder %s1021_s22, 1  ;;  %p130_p7 = scmp.eq.s32.totalorder %s127_s27, 0 }
   0xf   : > { %s1413_s26 = scalar_select %p1094_p4, 1, 0 }
  0x10   : > { %p1101_p8 = por %p149_p5, %p148_p3  ;;  %p156_p9 = scmp.lt.s32.totalorder %s1021_s22, 3 }
  0x11   : > { %s1107_s29 = scalar_select %p130_p7, %s1009_s19, %s132_s25  }
  0x12   : > { %s1414_s28 = scalar_select %p1101_p8, 1, 0 }
  0x13   : > { %p1109_p10 = pnand %p750_p6, %p156_p9  ;;  %p1113_p11 = scmp.eq.s32.totalorder %s748_s2, 0 }
  0x14   : > { %s169_s8 = sshll.u32 %s1404_s0, 4  ;;  %s180_s11 = sshll.u32 %s1405_s1, 4  ;;  %s170_s8 = int_to_ptr.vmem [resolvable:$true] %s169_s8  ;;  %s181_s11 = int_to_ptr.vmem [resolvable:$true] %s180_s11 }
  0x15   : > { %s1415_s30 = scalar_select %p1109_p10, 1, 0 }
  0x16   : > { %s1416_s5 = scalar_select %p1113_p11, 1, 0 }
  0x17   : > { %p839_p12 = pneg %p1109_p10  ;;  %s905_s13 = scalar_lea.vmem %s170_s8, 128 }
  0x18   : > { %p906_p0 = scmp.ne.s32.totalorder %s170_s8, %s905_s13  ;;  %p913_p5 = scmp.lt.s32.totalorder %s170_s8, %s170_s8 }
  0x19   : > { %p1127_p13 = pnand %p1113_p11, %p839_p12  ;;  %p914_p6 = scmp.lt.s32.totalorder %s905_s13, %s905_s13 }
  0x1b   : > { %p907_p1 = pneg %p1127_p13  ;;  %p915_p7 = por %p914_p6, %p913_p5 }
  0x1d   : > { %p908_p2 = pnand %p907_p1, %p906_p0 }
  0x1f   : > { %p909_p3 = pneg %p908_p2 }
  0x21   : > { %p916_p9 = pnand %p915_p7, %p909_p3 }
  0x23   : > { %919 = shalt.err (!%p916_p9)
}
  0x24   : > { %s1023_s14 = smov [#allocation3]   ;;  %s920_s15 = scalar_lea.vmem %s181_s11, 16 }
  0x25   : > { %842 = dma.vmem_to_smem (!%p1127_p13), %s170_s8, 128, %s1023_s14, [#allocation5]  }
  0x26   : > { %p921_p12 = scmp.ne.s32.totalorder %s181_s11, %s920_s15  ;;  %p928_p11 = scmp.lt.s32.totalorder %s181_s11, %s181_s11 }
  0x27   : > { %p929_p10 = scmp.lt.s32.totalorder %s920_s15, %s920_s15 }
  0x28   : > { %p923_p8 = pnand %p921_p12, %p907_p1 }
  0x29   : > { %p930_p0 = por %p929_p10, %p928_p11 }
  0x2a   : > { %p924_p4 = pneg %p923_p8 }
  0x2c   : > { %p931_p2 = pnand %p930_p0, %p924_p4 }
  0x2e   : > { %934 = shalt.err (!%p931_p2)
}
  0x2f   : > { %s1024_s16 = smov [#allocation6]   ;;  %p1418_p3 = scmp.ne.s32.totalorder %s1415_s30, 0 }
  0x30   : > { %845 = dma.vmem_to_smem (!%p1127_p13), %s181_s11, 16, %s1024_s16, [#allocation7]  }
  0x31   : > { %209 = sbr.rel (%p1418_p3) target bundleno = 133 (0x85), region = 36  ;;  %p1419_p5 = scmp.ne.s32.totalorder (!%p1418_p3), %s1416_s5, 0 }
  0x38   : > { %988 = dma.done.wait (%p1419_p5), [#allocation5], 128  }
  0x39   : > { %990 = vsyncadd (%p1419_p5), [#allocation5], 4294967168 }
  0x3a   : > { %992 = dma.done.wait (%p1419_p5), [#allocation7], 16  }
  0x3b   : > { %994 = vsyncadd (%p1419_p5), [#allocation7], 4294967280 }
  0x3c   : > { %219 = sfence }
  0x3d   : > { %p245_p4 = scmp.lt.s32.totalorder %s1013_s20, 1  ;;  %s255_s2 = sld [smem:[#allocation2]]  ;;  %v523_v0 = vlaneseq  ;;  %vm610_vm4 = vcmask 1040384   ;;  %vm613_vm6 = vcmask 1041408   ;;  %vm616_vm7 = vcmask 1042432  }
  0x3e   : > { %s257_s23 = sld [smem:[#allocation3]]  ;;  %s760_s27 = sld [smem:[#allocation3 + $0x1]]  ;;  %vm619_vm8 = vcmask 1043456   ;;  %vm622_vm9 = vcmask 1044480   ;;  %vm625_vm12 = vcmask 1045504   ;;  %vm628_vm14 = vcmask 1046528  }
  0x3f   : > { %s246_s25 = scalar_select %p245_p4, %s1013_s20, 1  ;;  %v524_v3 = vshrl.u32 %v523_v0, 7 }
  0x40   : > { %s762_s30 = sld [smem:[#allocation3 + $0x2]]  ;;  %s764_s7 = sld [smem:[#allocation3 + $0x3]] }
  0x41   : > { %s827_s6 = sshll.u32 %s246_s25, 3  ;;  %s1152_s11 = sld [smem:[#allocation6]]  ;;  %v1180_v12 = vsub.s32 0, %v524_v3  ;;  %v1182_v13 = vsub.s32 4, %v524_v3 }
  0x42   : > { %s252_s10 = scalar_lea.vmem %s1407_s3, %s827_s6  ;;  %s766_s5 = sld [smem:[#allocation3 + $0x80]] }
  0x43   : > { %s767_s12 = sld [smem:[#allocation3 + $0x81]]  ;;  %v1154_v1 = vld [vmem:[%s252_s10] sm:$0xff]  ;;  %s1156_s13 = sld [smem:[#allocation3 + $0x82]]  ;;  %v1174_v11 = vstv %s255_s2 }
  0x44   : > { %v258_v2 = vstv %s257_s23  ;;  %s1158_s14 = sld [smem:[#allocation3 + $0x83]]  ;;  %s1160_s15 = sld [smem:[#allocation3 + $0x100]]  ;;  %v261_v4 = vstv %s760_s27 }
  0x45   : > { %s1162_s16 = sld [smem:[#allocation3 + $0x101]]  ;;  %s1164_s25 = sld [smem:[#allocation3 + $0x102]]  ;;  %v259_v6 = vmul.f32 %v258_v2, %v1154_v1  ;;  %v262_v7 = vmul.f32 %v261_v4, %v1154_v1 }
  0x46   : > { %v269_v5 = vstv %s762_s30  ;;  %v277_v9 = vstv %s764_s7  ;;  %s1169_s23 = sld [smem:[#allocation6 + $0x1]]  ;;  %s1171_s6 = sld [smem:[#allocation3 + $0x103]] }
  0x47   : > { %v270_v8 = vmul.f32 %v269_v5, %v1154_v1  ;;  %v278_v10 = vmul.f32 %v277_v9, %v1154_v1  ;;  %s1176_s27 = sld [smem:[#allocation3 + $0x180]]  ;;  %s1178_s30 = sld [smem:[#allocation3 + $0x181]]  ;;  %v761_v14 = vrot.slane %v262_v7, 9  ;;  %v285_v18 = vstv %s1152_s11 }
  0x48   : > { %v292_v16 = vstv %s766_s5  ;;  %s1188_s2 = sld [smem:[#allocation3 + $0x182]]  ;;  %s1197_s8 = sld [smem:[#allocation3 + $0x183]] }
  0x49   : > { %v763_v15 = vrot.slane %v270_v8, 10  ;;  %v295_v17 = vstv %s767_s12  ;;  %v293_v19 = vmul.f32 %v292_v16, %v1154_v1  ;;  %v303_v21 = vstv %s1156_s13  ;;  %s1195_s7 = sld [smem:[#allocation6 + $0x2]]  ;;  %s1201_s9 = sld [smem:[#allocation6 + $0x3]] }
  0x4a   : > { %v296_v20 = vmul.f32 %v295_v17, %v1154_v1  ;;  %v267_v22 = vadd.f32 %v761_v14, %v259_v6  ;;  %v765_v23 = vrot.slane %v278_v10, 11  ;;  %v304_v24 = vmul.f32 %v303_v21, %v1154_v1  ;;  %s1205_s10 = sld [smem:[#allocation3 + $0x200]]  ;;  %s1209_s11 = sld [smem:[#allocation3 + $0x201]] }
  0x4b   : > { %v311_v25 = vstv %s1158_s14  ;;  %v325_v28 = vstv %s1160_s15  ;;  %v328_v29 = vstv %s1162_s16  ;;  %v336_v36 = vstv %s1164_s25  ;;  %s1214_s5 = sld [smem:[#allocation3 + $0x202]]  ;;  %s1216_s12 = sld [smem:[#allocation3 + $0x203]] }
  0x4c   : > { %v768_v26 = vrot.slane %v296_v20, 9  ;;  %v312_v27 = vmul.f32 %v311_v25, %v1154_v1  ;;  %v275_v30 = vadd.f32 %v763_v15, %v267_v22  ;;  %v770_v31 = vrot.slane %v304_v24, 10  ;;  %s1221_s13 = sld [smem:[#allocation6 + $0x4]]  ;;  %s1225_s14 = sld [smem:[#allocation3 + $0x280]] }
  0x4d   : > { %v326_v32 = vmul.f32 %v325_v28, %v1154_v1  ;;  %v329_v33 = vmul.f32 %v328_v29, %v1154_v1  ;;  %v344_v37 = vstv %s1171_s6  ;;  %v337_v40 = vmul.f32 %v336_v36, %v1154_v1  ;;  %s1227_s15 = sld [smem:[#allocation3 + $0x281]]  ;;  %s1233_s16 = sld [smem:[#allocation3 + $0x282]] }
  0x4e   : > { %v301_v34 = vadd.f32 %v768_v26, %v293_v19  ;;  %v772_v35 = vrot.slane %v312_v27, 11  ;;  %v283_v38 = vadd.f32 %v765_v23, %v275_v30  ;;  %v345_v41 = vmul.f32 %v344_v37, %v1154_v1  ;;  %s1235_s25 = sld [smem:[#allocation3 + $0x283]]  ;;  %s1245_s6 = sld [smem:[#allocation3 + $0x301]] }
  0x4f   : > { %v776_v39 = vrot.slane %v329_v33, 9  ;;  %v319_v43 = vstv %s1169_s23  ;;  %v358_v44 = vstv %s1176_s27  ;;  %v361_v45 = vstv %s1178_s30  ;;  %s1243_s23 = sld [smem:[#allocation3 + $0x300]]  ;;  %s1250_s27 = sld [smem:[#allocation6 + $0x5]] }
  0x50   : > { %v309_v42 = vadd.f32 %v770_v31, %v301_v34  ;;  %v286_v46 = vadd.f32 %v285_v18, %v283_v38  ;;  %v778_v48 = vrot.slane %v337_v40, 10  ;;  %v780_v49 = vrot.slane %v345_v41, 11  ;;  %s1255_s30 = sld [smem:[#allocation3 + $0x302]]  ;;  %p1420_p10 = scmp.ne.s32.totalorder %s1413_s26, 0 }
  0x51   : > { %v334_v47 = vadd.f32 %v776_v39, %v326_v32  ;;  %v359_v51 = vmul.f32 %v358_v44, %v1154_v1  ;;  %v362_v52 = vmul.f32 %v361_v45, %v1154_v1  ;;  %v369_v53 = vstv %s1188_s2  ;;  %s1261_s2 = sld [smem:[#allocation3 + $0x303]] }
  0x52   : > { %v317_v50 = vadd.f32 %v772_v35, %v309_v42  ;;  %vm287_vm0 = vcmp.gt.f32.partialorder %v286_v46, 0.0  ;;  %v289_v54 = vmul.f32 %v1174_v11, %v286_v46  ;;  %v370_v56 = vmul.f32 %v369_v53, %v1154_v1 }
  0x53   : > { %v342_v55 = vadd.f32 %v778_v48, %v334_v47  ;;  %v352_v58 = vstv %s1195_s7  ;;  %v784_v59 = vrot.slane %v362_v52, 9  ;;  %v377_v60 = vstv %s1197_s8  ;;  %s1266_s7 = sld [smem:[#allocation3 + $0x380]]  ;;  %s1270_s8 = sld [smem:[#allocation6 + $0x6]] }
  0x54   : > { %v320_v57 = vadd.f32 %v319_v43, %v317_v50  ;;  %v786_v62 = vrot.slane %v370_v56, 10  ;;  %v378_v63 = vmul.f32 %v377_v60, %v1154_v1  ;;  %v385_v0 = vstv %s1201_s9  ;;  %s1276_s9 = sld [smem:[#allocation3 + $0x381]] }
  0x55   : > { %v350_v61 = vadd.f32 %v780_v49, %v342_v55  ;;  %v1238_v2 = vsel %vm287_vm0, %v286_v46, %v289_v54  ;;  %v367_v4 = vadd.f32 %v784_v59, %v359_v51  ;;  %v391_v5 = vstv %s1205_s10  ;;  %s1280_s10 = sld [smem:[#allocation3 + $0x382]] }
  0x56   : > { %v322_v3 = vmul.f32 %v320_v57, %v1174_v11  ;;  %vm321_vm1 = vcmp.gt.f32.partialorder %v320_v57, 0.0  ;;  %v788_v7 = vrot.slane %v378_v63, 11  ;;  %v394_v8 = vstv %s1209_s11  ;;  %s1282_s11 = sld [smem:[#allocation3 + $0x383]] }
  0x57   : > { %v353_v6 = vadd.f32 %v352_v58, %v350_v61  ;;  %v375_v9 = vadd.f32 %v786_v62, %v367_v4  ;;  %v392_v10 = vmul.f32 %v391_v5, %v1154_v1  ;;  %v395_v14 = vmul.f32 %v394_v8, %v1154_v1 }
  0x58   : > { %v402_v15 = vstv %s1214_s5  ;;  %v410_v18 = vstv %s1216_s12  ;;  %v1258_v19 = vsel %vm321_vm1, %v320_v57, %v322_v3  ;;  %v418_v24 = vstv %s1221_s13  ;;  %s1300_s5 = sld [smem:[#allocation6 + $0x7]]  ;;  %s241_s12 = sand.u32 1, %s1005_s18  }
  0x59   : > { %vm354_vm2 = vcmp.gt.f32.partialorder %v353_v6, 0.0  ;;  %v355_v16 = vmul.f32 %v353_v6, %v1174_v11  ;;  %v403_v17 = vmul.f32 %v402_v15, %v1154_v1  ;;  %v383_v20 = vadd.f32 %v788_v7, %v375_v9  ;;  %s757_s13 = sshll.u32 %s241_s12, 4 }
  0x5a   : > { %v792_v21 = vrot.slane %v395_v14, 9  ;;  %v411_v22 = vmul.f32 %v410_v18, %v1154_v1  ;;  %v424_v25 = vstv %s1225_s14  ;;  %v427_v26 = vstv %s1227_s15  ;;  %s828_s14 = sshll.u32 %s1013_s20, 8  ;;  %s243_s15 = scalar_lea.vmem [#allocation8], %s757_s13 }
  0x5b   : > { %v794_v23 = vrot.slane %v403_v17, 10  ;;  %v1268_v27 = vsel %vm354_vm2, %v353_v6, %v355_v16  ;;  %v386_v28 = vadd.f32 %v385_v0, %v383_v20  ;;  %v425_v31 = vmul.f32 %v424_v25, %v1154_v1  ;;  %s634_s20 = scalar_lea.sflag [#allocation4], %s241_s12 }
  0x5c   : > { %v400_v29 = vadd.f32 %v792_v21, %v392_v10  ;;  %v796_v30 = vrot.slane %v411_v22, 11  ;;  %v428_v32 = vmul.f32 %v427_v26, %v1154_v1  ;;  %v435_v33 = vstv %s1233_s16  ;;  %s650_s16 = sshll.u32 %s243_s15, 4  ;;  %s1357_s16 = int_to_ptr.vmem [resolvable:$true] %s650_s16 }
  0x5d   : > { %v443_v34 = vstv %s1235_s25  ;;  %vm387_vm3 = vcmp.gt.f32.partialorder %v386_v28, 0.0  ;;  %v388_v35 = vmul.f32 %v386_v28, %v1174_v11  ;;  %v436_v37 = vmul.f32 %v435_v33, %v1154_v1 }
  0x5e   : > { %v408_v36 = vadd.f32 %v794_v23, %v400_v29  ;;  %v800_v38 = vrot.slane %v428_v32, 9  ;;  %v444_v39 = vmul.f32 %v443_v34, %v1154_v1  ;;  %v457_v40 = vstv %s1243_s23 }
  0x5f   : > { %v460_v41 = vstv %s1245_s6  ;;  %v802_v43 = vrot.slane %v436_v37, 10  ;;  %v451_v44 = vstv %s1250_s27  ;;  %v458_v45 = vmul.f32 %v457_v40, %v1154_v1  ;;  %s1355_s6 = scalar_lea.hbm %s1408_s4, %s828_s14  ;;  %s935_s27 = scalar_lea.vmem %s1357_s16, 256 }
  0x60   : > { %v416_v42 = vadd.f32 %v796_v30, %v408_v36  ;;  %v433_v46 = vadd.f32 %v800_v38, %v425_v31  ;;  %v804_v47 = vrot.slane %v444_v39, 11  ;;  %v461_v48 = vmul.f32 %v460_v41, %v1154_v1  ;;  %p936_p8 = scmp.ne.s32.totalorder %s1357_s16, %s935_s27 }
  0x61   : > { %v468_v49 = vstv %s1255_s30  ;;  %v1292_v50 = vsel %vm387_vm3, %v386_v28, %v388_v35  ;;  %v476_v53 = vstv %s1261_s2  ;;  %v490_v57 = vstv %s1266_s7  ;;  %s1025_s30 = smov [#allocation8]  }
  0x62   : > { %v419_v51 = vadd.f32 %v418_v24, %v416_v42  ;;  %v469_v52 = vmul.f32 %v468_v49, %v1154_v1  ;;  %v441_v54 = vadd.f32 %v802_v43, %v433_v46  ;;  %v808_v55 = vrot.slane %v461_v48, 9  ;;  %p937_p11 = pnand %p936_p8, %p1420_p10  ;;  %s939_s2 = sshll.u32 %s1025_s30, 4  ;;  %s940_s2 = int_to_ptr.vmem [resolvable:$false] %s939_s2 }
  0x63   : > { %v477_v56 = vmul.f32 %v476_v53, %v1154_v1  ;;  %v484_v60 = vstv %s1270_s8  ;;  %v493_v0 = vstv %s1276_s9  ;;  %v491_v3 = vmul.f32 %v490_v57, %v1154_v1  ;;  %s941_s7 = scalar_lea.vmem %s940_s2, 512  ;;  %p942_p1 = scmp.lt.s32.totalorder %s1357_s16, %s940_s2 }
  0x64   : > { %vm420_vm5 = vcmp.gt.f32.partialorder %v419_v51, 0.0  ;;  %v421_v58 = vmul.f32 %v419_v51, %v1174_v11  ;;  %v810_v59 = vrot.slane %v469_v52, 10  ;;  %v449_v61 = vadd.f32 %v804_v47, %v441_v54  ;;  %p938_p13 = pneg %p937_p11  ;;  %p943_p6 = scmp.lt.s32.totalorder %s941_s7, %s935_s27 }
  0x65   : > { %v466_v62 = vadd.f32 %v808_v55, %v458_v45  ;;  %v812_v63 = vrot.slane %v477_v56, 11  ;;  %v494_v4 = vmul.f32 %v493_v0, %v1154_v1  ;;  %v501_v5 = vstv %s1280_s10 }
  0x66   : > { %v509_v6 = vstv %s1282_s11  ;;  %v452_v7 = vadd.f32 %v451_v44, %v449_v61  ;;  %v502_v9 = vmul.f32 %v501_v5, %v1154_v1  ;;  %v422_v14 = vsel %vm420_vm5, %v419_v51, %v421_v58  ;;  %p944_p7 = por %p943_p6, %p942_p1 }
  0x67   : > { %v474_v8 = vadd.f32 %v810_v59, %v466_v62  ;;  %v510_v10 = vmul.f32 %v509_v6, %v1154_v1  ;;  %v816_v15 = vrot.slane %v494_v4, 9  ;;  %v526_v16 = vrot.slane %v1238_v2, %v1180_v12 }
  0x68   : > { %v530_v17 = vrot.slane %v1238_v2, %v1182_v13  ;;  %vm453_vm10 = vcmp.gt.f32.partialorder %v452_v7, 0.0  ;;  %v454_v18 = vmul.f32 %v452_v7, %v1174_v11  ;;  %v818_v21 = vrot.slane %v502_v9, 10  ;;  %p945_p9 = pnand %p944_p7, %p938_p13 }
  0x69   : > { %v482_v20 = vadd.f32 %v812_v63, %v474_v8  ;;  %v499_v22 = vadd.f32 %v816_v15, %v491_v3  ;;  %v820_v1 = vrot.slane %v510_v10, 11  ;;  %v537_v23 = vrot.slane %v1258_v19, %v1180_v12 }
  0x6a   : > { %v541_v24 = vrot.slane %v1258_v19, %v1182_v13  ;;  %v455_v25 = vsel %vm453_vm10, %v452_v7, %v454_v18  ;;  %v548_v2 = vrot.slane %v1268_v27, %v1180_v12  ;;  %v552_v28 = vrot.slane %v1268_v27, %v1182_v13 }
  0x6b   : > { %v485_v26 = vadd.f32 %v484_v60, %v482_v20  ;;  %v507_v29 = vadd.f32 %v818_v21, %v499_v22  ;;  %v517_v30 = vstv %s1300_s5  ;;  %v559_v31 = vrot.slane %v1292_v50, %v1180_v12 }
  0x6c   : > { %v563_v32 = vrot.slane %v1292_v50, %v1182_v13  ;;  %v570_v33 = vrot.slane %v422_v14, %v1180_v12  ;;  %v574_v34 = vrot.slane %v422_v14, %v1182_v13  ;;  %v581_v27 = vrot.slane %v455_v25, %v1180_v12 }
  0x6d   : > { %vm486_vm11 = vcmp.gt.f32.partialorder %v485_v26, 0.0  ;;  %v487_v19 = vmul.f32 %v485_v26, %v1174_v11  ;;  %v515_v35 = vadd.f32 %v820_v1, %v507_v29  ;;  %v611_v36 = vsel %vm610_vm4, %v526_v16, %v537_v23 }
  0x6e   : > { %v612_v37 = vsel %vm610_vm4, %v530_v17, %v541_v24  ;;  %v585_v39 = vrot.slane %v455_v25, %v1182_v13  ;;  %v614_v40 = vsel %vm613_vm6, %v611_v36, %v548_v2 }
  0x6f   : > { %v488_v38 = vsel %vm486_vm11, %v485_v26, %v487_v19  ;;  %v615_v41 = vsel %vm613_vm6, %v612_v37, %v552_v28  ;;  %v518_v42 = vadd.f32 %v517_v30, %v515_v35  ;;  %v617_v45 = vsel %vm616_vm7, %v614_v40, %v559_v31 }
  0x70   : > { %v592_v43 = vrot.slane %v488_v38, %v1180_v12  ;;  %v596_v44 = vrot.slane %v488_v38, %v1182_v13  ;;  %v618_v46 = vsel %vm616_vm7, %v615_v41, %v563_v32  ;;  %v620_v47 = vsel %vm619_vm8, %v617_v45, %v570_v33 }
  0x71   : > { %vm519_vm13 = vcmp.gt.f32.partialorder %v518_v42, 0.0  ;;  %v520_v48 = vmul.f32 %v518_v42, %v1174_v11  ;;  %v621_v49 = vsel %vm619_vm8, %v618_v46, %v574_v34  ;;  %v623_v50 = vsel %vm622_vm9, %v620_v47, %v581_v27 }
  0x72   : > { %v624_v51 = vsel %vm622_vm9, %v621_v49, %v585_v39  ;;  %v626_v53 = vsel %vm625_vm12, %v623_v50, %v592_v43 }
  0x73   : > { %v521_v52 = vsel %vm519_vm13, %v518_v42, %v520_v48  ;;  %v627_v54 = vsel %vm625_vm12, %v624_v51, %v596_v44 }
  0x74   : > { %v603_v55 = vrot.slane %v521_v52, %v1180_v12  ;;  %v607_v56 = vrot.slane %v521_v52, %v1182_v13 }
  0x76   : > { %v629_v11 = vsel %vm628_vm14, %v626_v53, %v603_v55  ;;  %v630_v57 = vsel %vm628_vm14, %v627_v54, %v607_v56 }
  0x77   : > { %631 = vst [vmem:[%s243_s15] sm:$0xff] %v629_v11  ;;  %632 = vst [vmem:[%s243_s15 + $0x8] sm:$0xff] %v630_v57 }
  0x78   : > { %948 = shalt.err (!%p945_p9)
}
  0x79   : > { %s949_s8 = scalar_lea.hbm %s1355_s6, 256  ;;  %s953_s11 = scalar_lea.hbm %s1408_s4, 512 }
  0x7a   : > { %p950_p12 = scmp.ne.s32.totalorder %s1355_s6, %s949_s8  ;;  %p954_p3 = scmp.lt.u32.totalorder %s1355_s6, %s1408_s4 }
  0x7b   : > { %p955_p5 = scmp.lt.u32.totalorder %s953_s11, %s949_s8  ;;  %p957_p8 = scmp.lt.u32.totalorder %s949_s8, %s1355_s6 }
  0x7c   : > { %p951_p0 = pnand %p950_p12, %p1420_p10 }
  0x7d   : > { %p956_p4 = por %p955_p5, %p954_p3 }
  0x7e   : > { %p952_p2 = pneg %p951_p0 }
  0x7f   : > { %p958_p11 = por %p957_p8, %p956_p4 }
  0x81   : > { %p959_p13 = pnand %p958_p11, %p952_p2 }
  0x83   : > { %962 = shalt.err (!%p959_p13)
}
  0x84   : > { %837 = dma.vmem_to_hbm [thread:$0]  (%p1420_p10), %s1357_s16, 256, %s1355_s6, %s634_s20  }
  0x85 PF: > { %p854_p1 = scmp.ge.s32.totalorder %s1021_s22, 2  ;;  %s662_s13 = sand.u32 1, %s1001_s17  }
  0x86   : > { %p1421_p6 = scmp.ne.s32.totalorder %s1414_s28, 0  ;;  %s663_s14 = scalar_lea.sflag [#allocation4], %s662_s13 }
  0x88   : > { %p847_p7 = pnand %p854_p1, %p1421_p6 }
  0x8a   : > { %996 = dma.done.wait (!%p847_p7), %s663_s14, 256  }
  0x8b   : > { %998 = vsyncadd (!%p847_p7), %s663_s14, 4294967040  ;;  %s20_s22 = sadd.s32 1, %s1021_s22   ;;  %s1422_s17 = smov %s1005_s18 }
  0x8c   : > { %p17_p9 = scmp.ge.s32.totalorder %s20_s22, 4   ;;  %s1423_s18 = smov %s1009_s19 }
  0x8d   : > { %s1424_s19 = smov %s1107_s29  ;;  %s1425_s20 = smov %s1017_s21 }
  0x8e   : > { %s1426_s21 = smov %s1428_s24  ;;  %19 = sbr.rel (!%p17_p9) target bundleno = 8 (0x8), region = 80 }
  0x95   :  { %668 = vsyncpa [#allocation4], 1 }
  0x96   :  { %670 = vsyncpa [#allocation4 + $0x1], 1 }
  0x97   :  { %671 = vsyncpa [#allocation5], 1 }
  0x98   :  { %673 = vsyncpa [#allocation5 + $0x1], 1 }
  0x99   :  { %674 = vsyncpa [#allocation7], 1 }

</bundles_post_ra>
